<compile_context>
chip_gen: v7x
topology: tpu7x:2x2x1
jax: 0.10.0
libtpu: 0.0.40
codegen_flags: <defaults>
</compile_context>

<pallas_src>
import numpy as np

import jax
import jax.numpy as jnp
from jax import lax
from jax.experimental import pallas as pl
from jax.experimental.pallas import tpu as pltpu

_FILT_1D = (0.25, 0.5, 0.25)   # [1,2,1]/4 ; separable factor of the 3x3 kernel


def _reflect_index(idx, size):
    # Reflect-pad(1) index map: r(-1)=1, r(size)=size-2, identity otherwise.
    return (size - 1) - abs((size - 1) - abs(idx))


def _downsample_matrix_np(out_size, in_size, stride):
    """A[i, m] = sum_d filt[d] * [m == reflect(stride*i + d - 1)].

    Folds reflect padding(1), the 1-D filter [1,2,1]/4 and the stride into a
    single matmul operand.  Built once on the host."""
    a = np.zeros((out_size, in_size), np.float32)
    for i in range(out_size):
        for d, wgt in enumerate(_FILT_1D):
            a[i, _reflect_index(stride * i + d - 1, in_size)] += wgt
    return a


def _downsample_kernel(a_even_ref, a_odd_ref, x_ref, o_ref):
    # a_even_ref: (W, Wo) = 0.50 * A_w^T   (centre H-filter tap folded in)
    # a_odd_ref:  (W, Wo) = 0.25 * A_w^T   (side   H-filter tap folded in)
    # x_ref:      (bc, Ho, 2W)  sublane row o of a channel = [row 2o | row 2o+1]
    # o_ref:      (bc, Ho, Wo)
    bc, ho, w2 = x_ref.shape
    w = w2 // 2
    wo = o_ref.shape[-1]
    op_dtype = a_even_ref.dtype

    flat = x_ref[...].reshape(bc * ho, w2)
    even = flat[:, :w].astype(op_dtype)        # pixel rows 2o
    odd = flat[:, w:].astype(op_dtype)         # pixel rows 2o+1

    # W-axis blur + stride-2 lane selection: two flat rank-2 MXU matmuls with
    # f32 accumulation (no batched dot_general, no operand broadcast).
    c_even = jnp.dot(even, a_even_ref[...], preferred_element_type=jnp.float32)
    c_odd = jnp.dot(odd, a_odd_ref[...], preferred_element_type=jnp.float32)
    c_even = c_even.reshape(bc, ho, wo)
    c_odd = c_odd.reshape(bc, ho, wo)

    # H-axis blur + stride:  out[o] = c_even[o] + c_odd[o] + c_odd[o-1];
    # reflect padding makes the o == 0 "previous" row equal to c_odd[0].
    o_ref[:, :1, :] = (c_even[:, :1, :] + 2.0 * c_odd[:, :1, :]).astype(o_ref.dtype)
    if ho > 1:
        o_ref[:, 1:, :] = (c_even[:, 1:, :] + c_odd[:, 1:, :]
                           + c_odd[:, :-1, :]).astype(o_ref.dtype)
    # TODO(synk): for Wo < 128 these stores are lane-masked; making them
    # lane-dense needs an HBM-side transpose that costs more traffic than it
    # saves for this mem-bound op.


def _vmem_capacity_bytes():
    try:
        return int(pltpu.get_tpu_info().vmem_capacity_bytes)
    except Exception:
        return 64 * 1024 * 1024        # conservative (v7x-sized) fallback


def _padded_channel_bytes(ho, w2, itemsize):
    # VMEM footprint of one channel's (Ho, 2W) slab, padded to (8, 128) tiles.
    return (-(-ho // 8) * 8) * (-(-w2 // 128) * 128) * itemsize


def _choose_blocking(nc, channel_bytes, budget_bytes):
    """Pick channels-per-block bc, grid steps nb and padded channel count.

    Constraints: bc * channel_bytes <= budget; nb even and >= 2 when nc > 1
    (v7x shards the "parallel" grid axis across two TensorCores); prefer an
    exact divisor of nc (no padding copy), otherwise pad the channel axis."""
    cap = max(1, budget_bytes // max(1, channel_bytes))
    if nc <= 1:
        return 1, 1, 1
    nb_min = -(-nc // cap)                      # ceil: steps needed for budget
    nb_min = max(2, nb_min + (nb_min & 1))      # even, >= 2
    best = None
    d = 1
    while d * d <= nc:
        if nc % d == 0:
            for q in (d, nc // d):              # q = candidate step count
                if q >= nb_min and q % 2 == 0 and (best is None or q < best):
                    best = q
        d += 1
    if best is not None and best <= 4 * nb_min:
        return nc // best, best, nc             # exact divisor, no padding
    bc = -(-nc // nb_min)                       # pad: one extra HBM copy of x
    return bc, nb_min, bc * nb_min


def _const_spec(shape):
    """BlockSpec for a loop-invariant (constant block index) operand.

    Single-buffered: the block never changes, so the default second pipeline
    buffer would just be a dead copy in VMEM."""
    index_map = lambda b: (0,) * len(shape)
    try:
        return pl.BlockSpec(shape, index_map, pipeline_mode=pl.Buffered(1))
    except Exception:
        return pl.BlockSpec(shape, index_map)


def downsample(x, *, stride=2):
    """Pallas equivalent of Downsample(channels=C, filt_size=3, stride=2).forward(x)."""
    if stride != 2:
        # TODO(synk): the row-pair layout below hard-codes stride 2 (the module
        # default); other strides would need the dense-matrix formulation.
        raise NotImplementedError("only stride=2 is implemented")
    N, C, H, W = x.shape
    assert H >= 2 and W >= 2, "reflect pad(1) requires spatial dims >= 2"
    Ho = (H - 1) // 2 + 1
    Wo = (W - 1) // 2 + 1
    nc = N * C

    xf = x.reshape(nc, H, W)
    if H % 2:
        # Odd H: append the reflected row (H-2) so the last output row's
        # "next" tap (reflect(H) == H-2) is materialised; makes H even.
        xf = jnp.concatenate([xf, xf[:, H - 2:H - 1, :]], axis=1)
    # Row-pair view: sublane row o of channel c holds [row 2o | row 2o+1].
    xr = xf.reshape(nc, Ho, 2 * W)              # free: contiguous HBM reshape

    # bf16 inputs keep bf16 MXU operands (the folded weights are exact in
    # bf16); everything else uses f32 operands.  Accumulation is always f32.
    op_dtype = jnp.bfloat16 if x.dtype == jnp.dtype(jnp.bfloat16) else jnp.float32
    a_w = _downsample_matrix_np(Wo, W, 2)                    # (Wo, W)
    a_even = jnp.asarray(0.5 * a_w.T, dtype=op_dtype)        # (W, Wo)
    a_odd = jnp.asarray(0.25 * a_w.T, dtype=op_dtype)        # (W, Wo)

    # Per-generation VMEM budget: ~3/4 of physical for the Mosaic limit and
    # ~1/8 of that for the (tile-padded) input block, leaving room for the
    # double-buffered input+output and the f32 temporaries.
    vmem_cap = _vmem_capacity_bytes()
    vmem_limit = max(32 * 1024 * 1024, min((3 * vmem_cap) // 4, 100 * 1024 * 1024))
    in_block_budget = vmem_limit // 8

    itemsize = jnp.dtype(x.dtype).itemsize
    bc, nb, nc_pad = _choose_blocking(
        nc, _padded_channel_bytes(Ho, 2 * W, itemsize), in_block_budget)
    if nc_pad > nc:
        xr = jnp.concatenate(
            [xr, jnp.zeros((nc_pad - nc, Ho, 2 * W), x.dtype)], axis=0)
    # TODO(synk): a single channel larger than the block budget (huge H*W) is
    # not spatially tiled; it falls back to one channel per step.

    out = pl.pallas_call(
        _downsample_kernel,
        out_shape=jax.ShapeDtypeStruct((nc_pad, Ho, Wo), x.dtype),
        grid_spec=pltpu.PrefetchScalarGridSpec(
            num_scalar_prefetch=0,
            grid=(nb,),
            in_specs=[
                _const_spec((W, Wo)),                         # a_even (resident)
                _const_spec((W, Wo)),                         # a_odd  (resident)
                pl.BlockSpec((bc, Ho, 2 * W), lambda b: (b, 0, 0)),
            ],
            out_specs=pl.BlockSpec((bc, Ho, Wo), lambda b: (b, 0, 0)),
        ),
        compiler_params=pltpu.CompilerParams(
            dimension_semantics=("parallel",),
            vmem_limit_bytes=vmem_limit,
        ),
    )(a_even, a_odd, xr)

    if nc_pad > nc:
        out = out[:nc]
    return out.reshape(N, C, Ho, Wo)


def downsample_ref(x, *, stride=2):
    """Pure-JAX reference mirroring the PyTorch forward exactly."""
    N, C, H, W = x.shape
    f1 = jnp.array([1.0, 2.0, 1.0], jnp.float32)
    filt = f1[:, None] * f1[None, :]
    filt = filt / jnp.sum(filt)
    w = jnp.broadcast_to(filt[None, None, :, :], (C, 1, 3, 3)).astype(x.dtype)
    xp = jnp.pad(x, ((0, 0), (0, 0), (1, 1), (1, 1)), mode="reflect")
    return lax.conv_general_dilated(
        xp, w, window_strides=(stride, stride), padding="VALID",
        dimension_numbers=("NCHW", "OIHW", "NCHW"),
        feature_group_count=C)


if __name__ == "__main__":
    key = jax.random.PRNGKey(0)
    x = jax.random.normal(key, (2, 4, 16, 16), dtype=jnp.float32)

    y = jax.block_until_ready(downsample(x))
    y_ref = jax.block_until_ready(downsample_ref(x))
    assert y.shape == (2, 4, 8, 8), y.shape
    assert y.dtype == x.dtype
    assert jnp.allclose(y, y_ref, atol=1e-5, rtol=1e-5), float(
        jnp.max(jnp.abs(y - y_ref)))

    # Odd spatial dims + channel-count padding path.
    x2 = jax.random.normal(jax.random.PRNGKey(0), (1, 3, 15, 13), dtype=jnp.float32)
    y2 = jax.block_until_ready(downsample(x2))
    y2_ref = jax.block_until_ready(downsample_ref(x2))
    assert y2.shape == y2_ref.shape, (y2.shape, y2_ref.shape)
    assert jnp.allclose(y2, y2_ref, atol=1e-5, rtol=1e-5), float(
        jnp.max(jnp.abs(y2 - y2_ref)))

    print("KERNEL_OK")
</pallas_src>

<mosaic_0001>
module attributes {stable_mosaic.version = 11 : i64} {
  func.func @_downsample_kernel(%arg0: i32, %arg1: memref<16x8xf32, #tpu.memory_space<vmem>>, %arg2: memref<16x8xf32, #tpu.memory_space<vmem>>, %arg3: memref<4x8x32xf32, #tpu.memory_space<vmem>>, %arg4: memref<4x8x8xf32, #tpu.memory_space<vmem>>) attributes {dimension_semantics = [#tpu.dimension_semantics<parallel>], iteration_bounds = array<i64: 2>, scalar_prefetch = 0 : i64, scratch_operands = 0 : i64, tpu.core_type = #tpu.core_type<tc>, window_params = [{pipeline_mode = #tpu.pipeline_mode<synchronous>, transform_indices = @transform_0, window_bounds = array<i64: 16, 8>}, {pipeline_mode = #tpu.pipeline_mode<synchronous>, transform_indices = @transform_1, window_bounds = array<i64: 16, 8>}, {transform_indices = @transform_2, window_bounds = array<i64: 4, 8, 32>}, {transform_indices = @transform_3, window_bounds = array<i64: 4, 8, 8>}]} {
    %c0 = arith.constant 0 : index
    %c0_0 = arith.constant 0 : index
    %c0_1 = arith.constant 0 : index
    %0 = vector.load %arg3[%c0, %c0_0, %c0_1] : memref<4x8x32xf32, #tpu.memory_space<vmem>>, vector<4x8x32xf32>
    %1 = vector.shape_cast %0 : vector<4x8x32xf32> to vector<32x32xf32>
    %2 = vector.extract_strided_slice %1 {offsets = [0, 0], sizes = [32, 16], strides = [1, 1]} : vector<32x32xf32> to vector<32x16xf32>
    %3 = vector.extract_strided_slice %1 {offsets = [0, 16], sizes = [32, 16], strides = [1, 1]} : vector<32x32xf32> to vector<32x16xf32>
    %c0_2 = arith.constant 0 : index
    %c0_3 = arith.constant 0 : index
    %4 = vector.load %arg1[%c0_2, %c0_3] : memref<16x8xf32, #tpu.memory_space<vmem>>, vector<16x8xf32>
    %cst = arith.constant dense<0.000000e+00> : vector<32x8xf32>
    %5 = tpu.matmul %2, %4, %cst {dimension_numbers = #tpu.dot_dimension_numbers<[1], [0], [0], [1], [0, 0, 1, 1], [], []>} : vector<32x16xf32>, vector<16x8xf32>, vector<32x8xf32> -> vector<32x8xf32>
    %c0_4 = arith.constant 0 : index
    %c0_5 = arith.constant 0 : index
    %6 = vector.load %arg2[%c0_4, %c0_5] : memref<16x8xf32, #tpu.memory_space<vmem>>, vector<16x8xf32>
    %cst_6 = arith.constant dense<0.000000e+00> : vector<32x8xf32>
    %7 = tpu.matmul %3, %6, %cst_6 {dimension_numbers = #tpu.dot_dimension_numbers<[1], [0], [0], [1], [0, 0, 1, 1], [], []>} : vector<32x16xf32>, vector<16x8xf32>, vector<32x8xf32> -> vector<32x8xf32>
    %8 = vector.shape_cast %5 : vector<32x8xf32> to vector<4x8x8xf32>
    %9 = vector.shape_cast %7 : vector<32x8xf32> to vector<4x8x8xf32>
    %10 = vector.extract_strided_slice %8 {offsets = [0, 0, 0], sizes = [4, 1, 8], strides = [1, 1, 1]} : vector<4x8x8xf32> to vector<4x1x8xf32>
    %11 = vector.extract_strided_slice %9 {offsets = [0, 0, 0], sizes = [4, 1, 8], strides = [1, 1, 1]} : vector<4x8x8xf32> to vector<4x1x8xf32>
    %cst_7 = arith.constant 2.000000e+00 : f32
    %12 = vector.broadcast %cst_7 : f32 to vector<4x1x8xf32>
    %13 = arith.mulf %12, %11 : vector<4x1x8xf32>
    %14 = arith.addf %10, %13 : vector<4x1x8xf32>
    %c0_8 = arith.constant 0 : index
    %c0_9 = arith.constant 0 : index
    %c0_10 = arith.constant 0 : index
    %15 = vector.load %arg4[%c0_8, %c0_9, %c0_10] : memref<4x8x8xf32, #tpu.memory_space<vmem>>, vector<4x1x8xf32>
    tpu.vector_store %arg4[%c0_8, %c0_9, %c0_10], %14 {strides = array<i32>} : memref<4x8x8xf32, #tpu.memory_space<vmem>>, vector<4x1x8xf32>,
    %16 = vector.extract_strided_slice %8 {offsets = [0, 1, 0], sizes = [4, 7, 8], strides = [1, 1, 1]} : vector<4x8x8xf32> to vector<4x7x8xf32>
    %17 = vector.extract_strided_slice %9 {offsets = [0, 1, 0], sizes = [4, 7, 8], strides = [1, 1, 1]} : vector<4x8x8xf32> to vector<4x7x8xf32>
    %18 = arith.addf %16, %17 : vector<4x7x8xf32>
    %19 = vector.extract_strided_slice %9 {offsets = [0, 0, 0], sizes = [4, 7, 8], strides = [1, 1, 1]} : vector<4x8x8xf32> to vector<4x7x8xf32>
    %20 = arith.addf %18, %19 : vector<4x7x8xf32>
    %c0_11 = arith.constant 0 : index
    %c1 = arith.constant 1 : index
    %c0_12 = arith.constant 0 : index
    %21 = vector.load %arg4[%c0_11, %c1, %c0_12] : memref<4x8x8xf32, #tpu.memory_space<vmem>>, vector<4x7x8xf32>
    tpu.vector_store %arg4[%c0_11, %c1, %c0_12], %20 {strides = array<i32>} : memref<4x8x8xf32, #tpu.memory_space<vmem>>, vector<4x7x8xf32>,
    return
  }
  func.func @transform_0(%arg0: i32) -> (i32, i32) {
    %c0_i32 = arith.constant 0 : i32
    %c0_i32_0 = arith.constant 0 : i32
    %c0_i32_1 = arith.constant 0 : i32
    return %c0_i32, %c0_i32_0 : i32, i32
  }
  func.func @transform_1(%arg0: i32) -> (i32, i32) {
    %c0_i32 = arith.constant 0 : i32
    %c0_i32_0 = arith.constant 0 : i32
    %c0_i32_1 = arith.constant 0 : i32
    return %c0_i32, %c0_i32_0 : i32, i32
  }
  func.func @transform_2(%arg0: i32) -> (i32, i32, i32) {
    %c0_i32 = arith.constant 0 : i32
    %c0_i32_0 = arith.constant 0 : i32
    %c0_i32_1 = arith.constant 0 : i32
    return %arg0, %c0_i32, %c0_i32_0 : i32, i32, i32
  }
  func.func @transform_3(%arg0: i32) -> (i32, i32, i32) {
    %c0_i32 = arith.constant 0 : i32
    %c0_i32_0 = arith.constant 0 : i32
    %c0_i32_1 = arith.constant 0 : i32
    return %arg0, %c0_i32, %c0_i32_0 : i32, i32, i32
  }
}

</mosaic_0001>

<bundles_post_ra>
// kernel: tpu_custom_call.1
= control target key start
LH: loop header
LB: loop body
LE: loop exit
PB: predicated region body
PF: predicated region fallthrough
CT: control target
= control target key end

     0   :  { %8 = vsyncpa [#allocation3], 0  ;;  %s957_s0 = inlined_call_operand.vmem [shape: f32[16,8], index: 0, kind: input, shape index: {}]   ;;  %s958_s1 = inlined_call_operand.vmem [shape: f32[16,8], index: 1, kind: input, shape index: {}]   ;;  %s959_s2 = inlined_call_operand.hbm [shape: f32[8,8,32], index: 2, kind: input, shape index: {}]   ;;  %s960_s3 = inlined_call_operand.hbm [shape: f32[8,8,8], index: 3, kind: output, shape index: {}]  }
   0x1   :  { %10 = vsyncpa [#allocation3 + $0x1], 0 }
   0x2   :  { %11 = vsyncpa [#allocation4], 0 }
   0x3   :  { %13 = vsyncpa [#allocation4 + $0x1], 0  ;;  %s763_s12 = smov 0   ;;  %s765_s13 = smov 0  }
   0x4   :  { %s767_s14 = smov 0   ;;  %s769_s15 = smov 0  }
   0x5 LB: > { %s784_s16 = sadd.s32 4294967295, %s734_s15   ;;  %s523_s17 = sadd.s32 4294967294, %s734_s15   ;;  %s734_s15 = sphi %s769_s15, %s973_s15   ;;  %s730_s14 = sphi %s767_s14, %s972_s14   ;;  %s726_s13 = sphi %s765_s13, %s971_s13   ;;  %s722_s12 = sphi %s763_s12, %s970_s12  }
   0x6   : > { %s788_s18 = sadd.s32 1, %s734_s15   ;;  %s68_s19 = sadd.s32 1, %s730_s14 }
   0x7   : > { %s65_s20 = ssub.s32 %s734_s15, %s788_s18  ;;  %p75_p0 = scmp.ne.s32.totalorder %s730_s14, %s726_s13 }
   0x8   : > { %p66_p1 = scmp.eq.s32.totalorder %s65_s20, 0  ;;  %p76_p2 = scmp.eq.s32.totalorder %s734_s15, 0 }
   0x9   : > { %p81_p3 = scmp.ne.s32.totalorder %s726_s13, %s722_s12  ;;  %p82_p4 = scmp.eq.s32.totalorder %s784_s16, 0 }
   0xa   : > { %s800_s21 = scalar_select %p66_p1, %s730_s14, %s68_s19  }
   0xb   : > { %p802_p5 = por %p76_p2, %p75_p0  ;;  %p806_p6 = por %p82_p4, %p81_p3 }
   0xc   : > { %p105_p7 = scmp.eq.s32.totalorder %s784_s16, 1  ;;  %p111_p8 = scmp.eq.s32.totalorder %s523_s17, 1 }
   0xd   : > { %p599_p10 = scmp.lt.s32.totalorder %s734_s15, 2  ;;  %s137_s26 = sand.u32 1, %s730_s14  }
   0xe   : > { %p813_p11 = por %p105_p7, %p75_p0  ;;  %p817_p12 = por %p111_p8, %p81_p3 }
   0xf   : > { %s545_s27 = sshll.u32 %s734_s15, 9  ;;  %s526_s28 = sshll.u32 %s137_s26, 5 }
  0x10   : > { %s964_s24 = scalar_select %p813_p11, 1, 0 }
  0x11   : > { %s965_s25 = scalar_select %p817_p12, 1, 0 }
  0x12   : > { %s826_s4 = scalar_lea.hbm %s959_s2, %s545_s27  ;;  %s141_s5 = scalar_lea.vmem [#allocation2], %s526_s28 }
  0x13   : > { %s148_s6 = sshll.u32 %s141_s5, 4  ;;  %p830_p13 = pnand %p599_p10, %p802_p5  ;;  %s834_s6 = int_to_ptr.vmem [resolvable:$true] %s148_s6 }
  0x14   : > { %s836_s8 = scalar_lea.sflag [#allocation3], %s137_s26  ;;  %s638_s9 = scalar_lea.hbm %s826_s4, 512 }
  0x15   : > { %p639_p0 = scmp.ne.s32.totalorder %s826_s4, %s638_s9  ;;  %p640_p1 = pneg %p830_p13 }
  0x16   : > { %s643_s17 = scalar_lea.hbm %s959_s2, 1024  ;;  %p644_p4 = scmp.lt.u32.totalorder %s826_s4, %s959_s2 }
  0x17   : > { %p641_p2 = pnand %p640_p1, %p639_p0  ;;  %p645_p5 = scmp.lt.u32.totalorder %s643_s17, %s638_s9 }
  0x18   : > { %p647_p8 = scmp.lt.u32.totalorder %s638_s9, %s826_s4 }
  0x19   : > { %p642_p3 = pneg %p641_p2  ;;  %p646_p7 = por %p645_p5, %p644_p4 }
  0x1b   : > { %p648_p10 = por %p647_p8, %p646_p7 }
  0x1d   : > { %p649_p9 = pnand %p648_p10, %p642_p3 }
  0x1f   : > { %652 = shalt.err (!%p649_p9)
}
  0x20   : > { %s653_s22 = scalar_lea.vmem %s834_s6, 512  ;;  %s736_s26 = smov [#allocation2]  }
  0x21   : > { %p654_p0 = scmp.ne.s32.totalorder %s834_s6, %s653_s22  ;;  %s658_s27 = sshll.u32 %s736_s26, 4  ;;  %s659_s27 = int_to_ptr.vmem [resolvable:$false] %s658_s27 }
  0x22   : > { %s660_s28 = scalar_lea.vmem %s659_s27, 1024  ;;  %p661_p11 = scmp.lt.s32.totalorder %s834_s6, %s659_s27 }
  0x23   : > { %p656_p2 = pnand %p654_p0, %p640_p1  ;;  %p662_p4 = scmp.lt.s32.totalorder %s660_s28, %s653_s22 }
  0x25   : > { %p657_p12 = pneg %p656_p2  ;;  %p663_p5 = por %p662_p4, %p661_p11 }
  0x27   : > { %p664_p7 = pnand %p663_p5, %p657_p12 }
  0x29   : > { %667 = shalt.err (!%p664_p7)
}
  0x2a   : > { %s737_s29 = smov 128   ;;  %s738_s30 = smov 8  }
  0x2b   : > { %594 = dma.hbm_to_vmem [thread:$0]  (!%p830_p13), %s826_s4, 512, %s834_s6, %s836_s8, %s737_s29, %s737_s29, %s738_s30  }
  0x2c   : > { %p529_p9 = scmp.ge.s32.totalorder %s734_s15, 1  ;;  %p156_p1 = scmp.lt.s32.totalorder %s734_s15, 3 }
  0x2e   : > { %p157_p3 = pnand %p529_p9, %p156_p1 }
  0x2f   : > { %s867_s5 = sand.u32 (!%p157_p3), 1, %s726_s13  }
  0x30   : > { %160 = sbr.rel (%p157_p3) target bundleno = 413 (0x19d), region = 32  ;;  %s530_s9 = sshll.u32 (!%p157_p3), %s867_s5, 5 }
  0x31   : > { %s163_s10 = scalar_lea.sflag (!%p157_p3), [#allocation3], %s867_s5  ;;  %s166_s11 = scalar_lea.vmem (!%p157_p3), [#allocation2], %s530_s9 }
  0x37   : > { %713 = dma.done.wait (%p806_p6), %s163_s10, 512  }
  0x38   : > { %715 = vsyncadd (%p806_p6), %s163_s10, 4294966784  ;;  %v191_v0 = vld [vmem:[%s166_s11] sm:$0xff]  ;;  %v193_v1 = vld [vmem:[%s166_s11 + $0x10] sm:$0xff]  ;;  %s739_s4 = smov 112   ;;  %vm197_vm0 = vcmask 130048   ;;  %vm406_vm1 = vcmask 57344  }
  0x39   : > { %v192_v2 = vld [vmem:[%s166_s11 + $0x8] sm:$0xff]  ;;  %297 = vrot.lane.b32.xlu0 %v191_v0, %s739_s4  ;;  %301 = vrot.lane.b32.xlu1 %v193_v1, %s739_s4  ;;  %v194_v3 = vld [vmem:[%s166_s11 + $0x18] sm:$0xff]  ;;  %vm431_vm2 = vcmask 64513   ;;  %s546_s26 = sshll.u32 %s784_s16, 9  ;;  %s188_s27 = scalar_lea.vmem [#allocation5], %s530_s9 }
  0x3a   : > { %v195_v4 = vld [vmem:[%s957_s0] sm:$0xff]  ;;  %v196_v5 = vld [vmem:[%s957_s0 + $0x8] sm:$0xff]  ;;  %563 = vmatprep.mubr.msk.f32.mxu0 %vm197_vm0, %v191_v0  ;;  %s450_s28 = sshll.u32 %s188_s27, 4  ;;  %s907_s30 = scalar_lea.hbm %s960_s3, %s546_s26  ;;  %s909_s28 = int_to_ptr.vmem [resolvable:$true] %s450_s28 }
  0x3b   : > { %v295_v6 = vld [vmem:[%s958_s1] sm:$0xff]  ;;  %v296_v7 = vld [vmem:[%s958_s1 + $0x8] sm:$0xff]  ;;  %v579_v8 = vpack.c.bf16 %v196_v5, %v195_v4  ;;  %s437_s9 = scalar_lea.sflag [#allocation4], %s867_s5  ;;  %s668_s10 = scalar_lea.vmem %s909_s28, 512 }
  0x3c   : > { %v583_v9 = vpack.c.bf16 %v296_v7, %v295_v6  ;;  %p669_p6 = scmp.ne.s32.totalorder %s909_s28, %s668_s10  ;;  %p967_p11 = scmp.ne.s32.totalorder %s964_s24, 0 }
  0x3d   : > { %299 = vrot.lane.b32.xlu0 %v192_v2, %s739_s4  ;;  %303 = vrot.lane.b32.xlu1 %v194_v3, %s739_s4  ;;  %s740_s11 = smov [#allocation5]  }
  0x3e   : > { %580 = vmatprep.subr.bf16.mxu0 %v579_v8  ;;  %584 = vmatprep.subr.bf16.mxu1 %v583_v9  ;;  %p670_p12 = pnand %p669_p6, %p967_p11  ;;  %s672_s4 = sshll.u32 %s740_s11, 4  ;;  %s673_s4 = int_to_ptr.vmem [resolvable:$false] %s672_s4 }
  0x3f   : > { %582 = vmatpush3.bf16.msra.mxu0 %v579_v8  ;;  %586 = vmatpush3.bf16.msra.mxu1 %v583_v9  ;;  %s674_s6 = scalar_lea.vmem %s673_s4, 1024  ;;  %p675_p8 = scmp.lt.s32.totalorder %s909_s28, %s673_s4 }
  0x40   : > { %p671_p13 = pneg %p670_p12  ;;  %p676_p10 = scmp.lt.s32.totalorder %s674_s6, %s668_s10 }
  0x42   : > { %564 = vmatmul.mubr.msk.f32.vlgmr.msra.gmra.mrb[0].mxu0 %vm197_vm0, %v192_v2  ;;  %p677_p0 = por %p676_p10, %p675_p8 }
  0x43   : > { %566 = vmatprep.mubr.msk.f32.mxu0 %vm197_vm0, %v193_v1 }
  0x44   : > { %p678_p2 = pnand %p677_p0, %p671_p13 }
  0x46   : > { %567 = vmatmul.mubr.msk.f32.gmra.mrb[2].mxu0 %vm197_vm0, %v194_v3 }
  0xab   : > { %v298_v10 = vpop.permute.xlu0 %297  ;;  %v302_v11 = vpop.permute.xlu1 %301 }
  0xac   : > { %573 = vmatprep.mubr.msk.f32.mxu1 %vm197_vm0, %v298_v10 }
  0xaf   : > { %v300_v12 = vpop.permute.xlu0 %299  ;;  %v304_v13 = vpop.permute.xlu1 %303 }
  0xb0   : > { %574 = vmatmul.mubr.msk.f32.vlgmr.msra.gmra.mrb[0].mxu1 %vm197_vm0, %v300_v12 }
  0xb1   : > { %576 = vmatprep.mubr.msk.f32.mxu1 %vm197_vm0, %v302_v11 }
  0xb4   : > { %577 = vmatmul.mubr.msk.f32.gmra.mrb[2].mxu1 %vm197_vm0, %v304_v13 }
 0x115   : > { %v565_v14 = vpop.f32.mrb[0].mxu0 }
 0x116   : > { %v276_v15 = vpop.f32.mrb[1].mxu0 }
 0x119   : > { %v568_v16 = vpop.f32.mrb[2].mxu0 }
 0x11a   : > { %v286_v17 = vpop.f32.mrb[3].mxu0 }
 0x183   : > { %v575_v18 = vpop.f32.mrb[0].mxu1 }
 0x184   : > { %v399_v19 = vmul.f32 2.0, %v575_v18  ;;  %v412_v20 = vadd.f32 %v575_v18, %v565_v14  ;;  %v420_v21 = vrot.slane %v575_v18, 7  ;;  %v379_v22 = vpop.f32.mrb[1].mxu1 }
 0x185   : > { %v398_v23 = vmul.f32 2.0, %v379_v22  ;;  %v411_v24 = vadd.f32 %v379_v22, %v276_v15  ;;  %v419_v25 = vrot.slane %v379_v22, 7 }
 0x186   : > { %v403_v26 = vadd.f32 %v565_v14, %v399_v19  ;;  %v428_v27 = vadd.f32 %v420_v21, %v412_v20 }
 0x187   : > { %v402_v28 = vadd.f32 %v398_v23, %v276_v15  ;;  %v427_v29 = vadd.f32 %v419_v25, %v411_v24  ;;  %v578_v30 = vpop.f32.mrb[2].mxu1 }
 0x188   : > { %408 = vst.msk [vmem:[%s188_s27 + $0x8] sm:$0x1] %vm406_vm1, %v403_v26  ;;  %v401_v31 = vmul.f32 2.0, %v578_v30  ;;  %v414_v32 = vadd.f32 %v578_v30, %v568_v16  ;;  %v422_v33 = vrot.slane %v578_v30, 7  ;;  %v389_v34 = vpop.f32.mrb[3].mxu1 }
 0x189   : > { %433 = vst.msk [vmem:[%s188_s27 + $0x8] sm:$0xfe] %vm431_vm2, %v428_v27  ;;  %432 = vst.msk [vmem:[%s188_s27] sm:$0xfe] %vm431_vm2, %v427_v29  ;;  %v400_v35 = vmul.f32 2.0, %v389_v34  ;;  %v413_v36 = vadd.f32 %v389_v34, %v286_v17  ;;  %v421_v37 = vrot.slane %v389_v34, 7 }
 0x18a   : > { %407 = vst.msk [vmem:[%s188_s27] sm:$0x1] %vm406_vm1, %v402_v28  ;;  %v405_v38 = vadd.f32 %v568_v16, %v401_v31  ;;  %v430_v39 = vadd.f32 %v422_v33, %v414_v32 }
 0x18b   : > { %v404_v40 = vadd.f32 %v400_v35, %v286_v17  ;;  %v429_v41 = vadd.f32 %v421_v37, %v413_v36 }
 0x18c   : > { %410 = vst.msk [vmem:[%s188_s27 + $0x18] sm:$0x1] %vm406_vm1, %v405_v38 }
 0x18d   : > { %435 = vst.msk [vmem:[%s188_s27 + $0x18] sm:$0xfe] %vm431_vm2, %v430_v39  ;;  %434 = vst.msk [vmem:[%s188_s27 + $0x10] sm:$0xfe] %vm431_vm2, %v429_v41 }
 0x18e   : > { %409 = vst.msk [vmem:[%s188_s27 + $0x10] sm:$0x1] %vm406_vm1, %v404_v40 }
 0x18f   : > { %681 = shalt.err (!%p678_p2)
}
 0x190   : > { %s682_s7 = scalar_lea.hbm %s907_s30, 512  ;;  %s686_s19 = scalar_lea.hbm %s960_s3, 1024 }
 0x191   : > { %p683_p4 = scmp.ne.s32.totalorder %s907_s30, %s682_s7  ;;  %p687_p9 = scmp.lt.u32.totalorder %s907_s30, %s960_s3 }
 0x192   : > { %p688_p1 = scmp.lt.u32.totalorder %s686_s19, %s682_s7  ;;  %p690_p6 = scmp.lt.u32.totalorder %s682_s7, %s907_s30 }
 0x193   : > { %p684_p5 = pnand %p683_p4, %p967_p11 }
 0x194   : > { %p689_p3 = por %p688_p1, %p687_p9 }
 0x195   : > { %p685_p7 = pneg %p684_p5 }
 0x196   : > { %p691_p12 = por %p690_p6, %p689_p3 }
 0x198   : > { %p692_p13 = pnand %p691_p12, %p685_p7 }
 0x19a   : > { %695 = shalt.err (!%p692_p13)
}
 0x19b   : > { %s741_s22 = smov 128   ;;  %s742_s26 = smov 8  }
 0x19c   : > { %589 = dma.vmem_to_hbm [thread:$0]  (%p967_p11), %s909_s28, 512, %s907_s30, %s437_s9, %s741_s22, %s741_s22, %s742_s26  }
 0x19d PF: > { %s465_s27 = sand.u32 1, %s722_s12   ;;  %p968_p8 = scmp.ne.s32.totalorder %s965_s25, 0 }
 0x19e   : > { %p969_p10 = scmp.ge.s32.totalorder %s734_s15, 2  ;;  %s466_s16 = scalar_lea.sflag [#allocation4], %s465_s27 }
 0x1a0   : > { %p596_p0 = pnand %p969_p10, %p968_p8 }
 0x1a2   : > { %717 = dma.done.wait (!%p596_p0), %s466_s16, 512  }
 0x1a3   : > { %719 = vsyncadd (!%p596_p0), %s466_s16, 4294966784  ;;  %p16_p2 = scmp.ge.s32.totalorder %s788_s18, 4   ;;  %s970_s12 = smov %s726_s13 }
 0x1a4   : > { %s971_s13 = smov %s730_s14  ;;  %s972_s14 = smov %s800_s21 }
 0x1a5   : > { %s973_s15 = smov %s788_s18  ;;  %18 = sbr.rel (!%p16_p2) target bundleno = 5 (0x5), region = 77 }
 0x1ac   :  { %471 = vsyncpa [#allocation3], 1 }
 0x1ad   :  { %473 = vsyncpa [#allocation3 + $0x1], 1 }
 0x1ae   :  { %474 = vsyncpa [#allocation4], 1 }
 0x1af   :  { %476 = vsyncpa [#allocation4 + $0x1], 1 }

</bundles_post_ra>
